<compile_context>
chip_gen: v5e
topology: v5e:2x2
jax: 0.10.0
libtpu: 0.0.40
codegen_flags: <defaults>
</compile_context>

<pallas_src>
import jax
import jax.numpy as jnp
from jax.experimental import pallas as pl
from jax.experimental.pallas import tpu as pltpu


def _round_up(x, m):
    return ((x + m - 1) // m) * m


# ---------------------------------------------------------------------------
# Kernel: y = relu(x @ W_comb + b_comb) over one batch tile.
# ---------------------------------------------------------------------------
def fused_mlp_kernel(x_ref, w_ref, b_ref, o_ref):
    # x tile: [tb, L] f32 ; folded weight [L, O] f32 (VMEM-resident) ; bias [1, O] f32.
    h = jnp.dot(x_ref[...], w_ref[...], preferred_element_type=jnp.float32)
    h = h + b_ref[...]
    # dropout(p=0.1) is identity at inference time (eval mode)
    # TODO(synk): training-mode dropout (stochastic masking) not implemented.
    o_ref[...] = jnp.maximum(h, 0.0).astype(o_ref.dtype)


# ---------------------------------------------------------------------------
# One-time algebraic fold of the four Linear layers (done at init, cached).
# ---------------------------------------------------------------------------
def fold_params(params):
    """Compose the 4 linears into a single (W_comb [L, O], b_comb [1, O]) in f32."""
    hp = jax.lax.Precision.HIGHEST
    w1, b1 = params["w1"], params["b1"]
    w3, b3 = params["w3"], params["b3"]
    w4, b4 = params["w4"], params["b4"]
    wo, bo = params["wo"], params["bo"]
    w = jnp.dot(jnp.dot(jnp.dot(w1, w3, precision=hp), w4, precision=hp),
                wo, precision=hp)
    b = jnp.dot(jnp.dot(jnp.dot(b1, w3, precision=hp) + b3, w4, precision=hp) + b4,
                wo, precision=hp) + bo
    return w.astype(jnp.float32), b.astype(jnp.float32)


# ---------------------------------------------------------------------------
# Batch-tile selection (generation-aware VMEM budget).
# ---------------------------------------------------------------------------
def _choose_tb(B, L, O, target_tb=2048):
    try:
        vmem_cap = pltpu.get_tpu_info().vmem_capacity_bytes
    except Exception:
        vmem_cap = 64 * 1024 * 1024          # conservative (v7x per-core VMEM)
    budget = (2 * vmem_cap) // 3

    padded_b = _round_up(B, 8)
    tb = min(target_tb, padded_b)
    if tb >= 256:
        tb = (tb // 256) * 256               # full MXU M passes on v6e/v7x
    tb = max(_round_up(tb, 8), 8)            # sublane multiple

    resident = L * O * 4 + O * 4             # folded weight + bias (f32), tiny

    def step_bytes(t):
        # double-buffered f32 x tile + double-buffered f32 out tile + live f32 result
        return 2 * t * L * 4 + 2 * t * O * 4 + t * O * 4

    while tb > 8 and resident + step_bytes(tb) > budget:
        tb = max(8, _round_up(tb // 2, 8))

    # Megacore (v7x): split into >=2 parallel grid steps only when each half is
    # still big enough (>=256 rows) for the step overhead to be worth it.
    if tb >= padded_b and padded_b >= 512:
        half = _round_up((padded_b + 1) // 2, 8)
        if half >= 256:
            tb = half
    return tb


# ---------------------------------------------------------------------------
# Wrapper.
# ---------------------------------------------------------------------------
def mlp_forward(x, w_comb, b_comb, *, tb=None):
    """x: [B, L] float32. w_comb: [L, O] f32. b_comb: [1, O] f32."""
    B, L = x.shape
    O = w_comb.shape[1]

    if tb is None:
        tb = _choose_tb(B, L, O)
    grid = (pl.cdiv(B, tb),)

    resident = L * O * 4 + O * 4
    needed = resident + 2 * tb * L * 4 + 2 * tb * O * 4 + tb * O * 4
    vmem_limit = int(min(48 * 1024 * 1024, max(16 * 1024 * 1024, 2 * needed)))

    cost = pl.CostEstimate(
        flops=2 * B * L * O,
        transcendentals=0,
        bytes_accessed=B * L * 4 + resident + B * O * 4,
    )

    # Grid-invariant folded weight/bias: whole array resident in VMEM,
    # no per-step double-buffering.
    vmem_spec = pl.BlockSpec(memory_space=pltpu.MemorySpace.VMEM)

    out = pl.pallas_call(
        fused_mlp_kernel,
        out_shape=jax.ShapeDtypeStruct((B, O), x.dtype),
        grid_spec=pltpu.PrefetchScalarGridSpec(
            num_scalar_prefetch=0,
            grid=grid,
            in_specs=[
                pl.BlockSpec((tb, L), lambda i: (i, 0)),   # x tiled over batch
                vmem_spec,                                 # W_comb
                vmem_spec,                                 # b_comb
            ],
            out_specs=pl.BlockSpec((tb, O), lambda i: (i, 0)),
        ),
        compiler_params=pltpu.CompilerParams(
            dimension_semantics=("parallel",),
            vmem_limit_bytes=vmem_limit),
        cost_estimate=cost,
    )(x, w_comb, b_comb)

    return out


# ---------------------------------------------------------------------------
# Parameter init mimicking nn.Linear (uniform +-1/sqrt(fan_in)).
# Weights are stored transposed: [in, out].
# ---------------------------------------------------------------------------
def init_params(key, input_len, output_len):
    dims = [
        ("w1", "b1", input_len, input_len * 4),
        ("w3", "b3", input_len * 4, input_len * 2),
        ("w4", "b4", input_len * 2, input_len),
        ("wo", "bo", input_len, output_len),
    ]
    params = {}
    for wname, bname, fan_in, fan_out in dims:
        key, kw, kb = jax.random.split(key, 3)
        bound = 1.0 / (fan_in ** 0.5)
        params[wname] = jax.random.uniform(
            kw, (fan_in, fan_out), jnp.float32, -bound, bound)
        params[bname] = jax.random.uniform(
            kb, (1, fan_out), jnp.float32, -bound, bound)
    return params


if __name__ == "__main__":
    input_len = 32
    output_len = 16
    batch = 8

    key = jax.random.PRNGKey(0)
    key, kx = jax.random.split(key)
    x = jax.random.normal(kx, (batch, input_len), dtype=jnp.float32)
    params = init_params(key, input_len, output_len)

    # One-time fold (equivalent of caching pre-processed weights at init).
    w_comb, b_comb = fold_params(params)
    w_comb, b_comb = jax.block_until_ready((w_comb, b_comb))

    out = mlp_forward(x, w_comb, b_comb)
    out = jax.block_until_ready(out)

    # Pure f32 unfolded reference (PyTorch forward semantics, eval mode).
    def ref_fwd(x, params):
        hp = jax.lax.Precision.HIGHEST
        h = jnp.dot(x, params["w1"], precision=hp) + params["b1"]
        h = jnp.dot(h, params["w3"], precision=hp) + params["b3"]
        h = jnp.dot(h, params["w4"], precision=hp) + params["b4"]
        h = jnp.dot(h, params["wo"], precision=hp) + params["bo"]
        return jnp.maximum(h, 0.0)

    ref = ref_fwd(x, params)
    assert out.shape == (batch, output_len)
    assert jnp.allclose(out, ref, atol=1e-2, rtol=1e-2), float(
        jnp.max(jnp.abs(out - ref)))

    print("KERNEL_OK")
</pallas_src>

<mosaic_0001>
module attributes {stable_mosaic.version = 11 : i64} {
  func.func @fused_mlp_kernel(%arg0: i32, %arg1: memref<8x32xf32, #tpu.memory_space<vmem>>, %arg2: memref<32x16xf32, #tpu.memory_space<vmem>>, %arg3: memref<1x16xf32, #tpu.memory_space<vmem>>, %arg4: memref<8x16xf32, #tpu.memory_space<vmem>>) attributes {dimension_semantics = [#tpu.dimension_semantics<parallel>], iteration_bounds = array<i64: 1>, scalar_prefetch = 0 : i64, scratch_operands = 0 : i64, tpu.core_type = #tpu.core_type<tc>, window_params = [{transform_indices = @transform_0, window_bounds = array<i64: 8, 32>}, {pipeline_mode = #tpu.pipeline_mode<synchronous>, transform_indices = @transform_1, window_bounds = array<i64: 32, 16>}, {pipeline_mode = #tpu.pipeline_mode<synchronous>, transform_indices = @transform_2, window_bounds = array<i64: 1, 16>}, {transform_indices = @transform_3, window_bounds = array<i64: 8, 16>}]} {
    %c0 = arith.constant 0 : index
    %c0_0 = arith.constant 0 : index
    %0 = vector.load %arg1[%c0, %c0_0] : memref<8x32xf32, #tpu.memory_space<vmem>>, vector<8x32xf32>
    %c0_1 = arith.constant 0 : index
    %c0_2 = arith.constant 0 : index
    %1 = vector.load %arg2[%c0_1, %c0_2] : memref<32x16xf32, #tpu.memory_space<vmem>>, vector<32x16xf32>
    %cst = arith.constant dense<0.000000e+00> : vector<8x16xf32>
    %2 = tpu.matmul %0, %1, %cst {dimension_numbers = #tpu.dot_dimension_numbers<[1], [0], [0], [1], [0, 0, 1, 1], [], []>} : vector<8x32xf32>, vector<32x16xf32>, vector<8x16xf32> -> vector<8x16xf32>
    %c0_3 = arith.constant 0 : index
    %c0_4 = arith.constant 0 : index
    %3 = vector.load %arg3[%c0_3, %c0_4] : memref<1x16xf32, #tpu.memory_space<vmem>>, vector<1x16xf32>
    %4 = vector.broadcast %3 : vector<1x16xf32> to vector<8x16xf32>
    %5 = arith.addf %2, %4 : vector<8x16xf32>
    %cst_5 = arith.constant 0.000000e+00 : f32
    %6 = vector.broadcast %cst_5 : f32 to vector<8x16xf32>
    %7 = arith.maximumf %5, %6 : vector<8x16xf32>
    %c0_6 = arith.constant 0 : index
    %c0_7 = arith.constant 0 : index
    %8 = vector.load %arg4[%c0_6, %c0_7] : memref<8x16xf32, #tpu.memory_space<vmem>>, vector<8x16xf32>
    tpu.vector_store %arg4[%c0_6, %c0_7], %7 {strides = array<i32>} : memref<8x16xf32, #tpu.memory_space<vmem>>, vector<8x16xf32>,
    return
  }
  func.func @transform_0(%arg0: i32) -> (i32, i32) {
    %c0_i32 = arith.constant 0 : i32
    %c0_i32_0 = arith.constant 0 : i32
    return %arg0, %c0_i32 : i32, i32
  }
  func.func @transform_1(%arg0: i32) -> (i32, i32) {
    %c0_i32 = arith.constant 0 : i32
    %c0_i32_0 = arith.constant 0 : i32
    %c0_i32_1 = arith.constant 0 : i32
    return %c0_i32, %c0_i32_0 : i32, i32
  }
  func.func @transform_2(%arg0: i32) -> (i32, i32) {
    %c0_i32 = arith.constant 0 : i32
    %c0_i32_0 = arith.constant 0 : i32
    %c0_i32_1 = arith.constant 0 : i32
    return %c0_i32, %c0_i32_0 : i32, i32
  }
  func.func @transform_3(%arg0: i32) -> (i32, i32) {
    %c0_i32 = arith.constant 0 : i32
    %c0_i32_0 = arith.constant 0 : i32
    return %arg0, %c0_i32 : i32, i32
  }
}

</mosaic_0001>

<bundles_post_ra>
// kernel: tpu_custom_call.1
= control target key start
LH: loop header
LB: loop body
LE: loop exit
PB: predicated region body
PF: predicated region fallthrough
CT: control target
= control target key end

     0   :  { %s138_s0 = inlined_call_operand.vmem [shape: f32[8,32], index: 0, kind: input, shape index: {}]   ;;  %s139_s1 = inlined_call_operand.vmem [shape: f32[32,16], index: 1, kind: input, shape index: {}]   ;;  %s140_s2 = inlined_call_operand.vmem [shape: f32[1,16], index: 2, kind: input, shape index: {}]   ;;  %s141_s3 = inlined_call_operand.hbm [shape: f32[8,16], index: 3, kind: output, shape index: {}]  }
   0x1   :  { %v19_v0 = vld [vmem:[%s139_s1 + $0x18] sm:$0xff]  ;;  %v18_v1 = vld [vmem:[%s139_s1 + $0x10] sm:$0xff]  ;;  %v17_v2 = vld [vmem:[%s139_s1 + $0x8] sm:$0xff] }
   0x2   :  { %40 = vmatpush.msra.mxu0 %v19_v0 }
   0x3   :  { %8 = vsyncpa [#allocation3], 0  ;;  %v16_v3 = vld [vmem:[%s139_s1] sm:$0xff]  ;;  %vm24_vm0 = vcmask 261120   ;;  %s96_s24 = smov [#allocation2]   ;;  %s58_s28 = sshll.u32 %s141_s3, 4  ;;  %s59_s28 = int_to_ptr.hbm [resolvable:$true] %s58_s28 }
   0x4   :  { %41 = vmatpush.msra.mxu0 %v18_v1  ;;  %v15_v4 = vld [vmem:[%s138_s0] sm:$0xff]  ;;  %s56_s25 = sshll.u32 %s96_s24, 4  ;;  %vm49_vm1 = vcmask 130048   ;;  %s57_s25 = int_to_ptr.vmem [resolvable:$true] %s56_s25 }
   0x5   :  { %v69_v5 = vld [vmem:[%s140_s2] ss:$0 sm:$0xff] }
   0x6   :  { %42 = vmatpush.msra.mxu0 %v17_v2 }
   0x8   :  { %43 = vmatpush.msra.mxu0 %v16_v3 }
   0x9   :  { %67 = vmatmul.msk.f32.vlgmr.msra.gmra.mxu0 %vm24_vm0, %v15_v4 }
  0x86   :  { %v45_v6 = vpop.f32.mrf.mxu0 }
  0x87   :  { %v46_v7 = vadd.f32 %v69_v5, %v45_v6 }
  0x89   :  { %v48_v8 = vmax.f32 %v46_v7, 0.0 }
  0x8b   :  { %50 = vst.msk [vmem:[#allocation2] sm:$0xff] %vm49_vm1, %v48_v8 }
  0x8c   :  { %61 = dma.vmem_to_hbm [thread:$0]  %s57_s25, 128, %s59_s28, [#allocation3]  }
  0x8d   :  { %94 = dma.done.wait [#allocation3], 128  }
  0x8e   :  { %95 = vsyncadd [#allocation3], 4294967168 }
  0x8f   :  { %66 = vsyncpa [#allocation3], 1 }

</bundles_post_ra>
